<compile_context>
chip_gen: v7x
topology: tpu7x:2x2x1
jax: 0.10.0
libtpu: 0.0.40
codegen_flags: <defaults>
</compile_context>

<pallas_src>
import jax
import jax.numpy as jnp
import numpy as np
from jax.experimental import pallas as pl
from jax.experimental.pallas import tpu as pltpu


LANE = 128   # TPU lane width


def _round_up(x, m):
    return ((x + m - 1) // m) * m


def _usable_vmem_bytes():
    """Generation-aware VMEM ceiling (~75% of physical: 48 MiB v7x, 96 MiB v5e/v6e)."""
    try:
        cap = int(pltpu.get_tpu_info().vmem_capacity_bytes)
    except Exception:
        cap = 64 * 2**20          # conservative fallback (v7x per-TC VMEM)
    return cap * 3 // 4


def _maybe_single_buffered(shape, index_map, single):
    """Constant-index (VMEM-resident) operands only need one pipeline buffer."""
    if single:
        try:
            return pl.BlockSpec(shape, index_map, pipeline_mode=pl.Buffered(1))
        except (AttributeError, TypeError):
            pass
    return pl.BlockSpec(shape, index_map)


# ---------------------------------------------------------------------------
# Kernel: fused two-head MLP over one hidden chunk
#   acc += ReLU(x @ W1[:, k] + b1[k]) @ W2[k, :];  out = acc + b2 on last chunk
# ---------------------------------------------------------------------------
def fused_two_head_kernel(x_ref, w1_ref, b1_ref, w2_ref, b2_ref, out_ref, acc_ref):
    k = pl.program_id(1)

    @pl.when(k == 0)
    def _init():
        acc_ref[...] = jnp.zeros_like(acc_ref)

    x = x_ref[...].astype(jnp.bfloat16)                      # f32 -> bf16 in-kernel
    # First layers of both heads (this hidden chunk): (Bt, D) @ (D, Ht) -> f32.
    h = jnp.dot(x, w1_ref[...], preferred_element_type=jnp.float32)
    h = jnp.maximum(h + b1_ref[...], 0.0)                    # bias + ReLU (f32)
    # Second layers, block-diagonal chunk: (Bt, Ht) @ (Ht, C_pad) -> f32 acc.
    acc_ref[...] += jnp.dot(h.astype(w2_ref.dtype), w2_ref[...],
                            preferred_element_type=jnp.float32)

    @pl.when(k == pl.num_programs(1) - 1)
    def _finalize():
        out_ref[...] = acc_ref[...] + b2_ref[...]            # lane-dense store


# ---------------------------------------------------------------------------
# Parameter packing (done once, outside the per-call wrapper)
# ---------------------------------------------------------------------------
def pack_params(params, num_classes, force_h_tile=None):
    """Fuse the two heads' weights into MXU/lane-friendly operands.

    First layers are concatenated into (D, 2H); second layers are packed
    block-diagonally into (2H, C_pad), so both heads run in two MXU pushes and
    produce a single lane-dense output.  If the fused weights exceed the VMEM
    budget, the hidden dim is padded to a multiple of a 128-aligned chunk size
    `h_tile` and streamed over a reduction grid axis (zero padding -> exact 0
    contribution to the accumulator).
    """
    w1m, b1m, w2m, b2m = params["w1m"], params["b1m"], params["w2m"], params["b2m"]
    w1a, b1a, w2a, b2a = params["w1a"], params["b1a"], params["w2a"], params["b2a"]
    D, H = w1m.shape
    H2 = 2 * H
    C = num_classes
    C_pad = _round_up(max(2 * C, LANE), LANE)        # lane-dense, unmasked stores

    usable = _usable_vmem_bytes()
    weight_budget = usable * 2 // 5                  # leave room for acts/out/acc/hidden
    # Single-buffered resident footprint (bf16 weights, f32 biases).
    resident_bytes = D * H2 * 2 + H2 * 4 + H2 * C_pad * 2 + C_pad * 4

    if force_h_tile is not None:
        h_tile = int(force_h_tile)
        H2p = _round_up(H2, h_tile)
    elif resident_bytes <= weight_budget:
        h_tile = H2p = H2                            # fully VMEM-resident weights
    else:
        # Stream the hidden dim in 128-col chunks (double-buffered while streaming).
        per_chunk = 2 * (D * LANE * 2 + LANE * 4 + LANE * C_pad * 2)
        n128 = max(1, weight_budget // max(per_chunk, 1))
        h_tile = min(LANE * n128, _round_up(H2, LANE))
        H2p = _round_up(H2, h_tile)

    # Zero-padded packing: padded hidden cols/rows contribute exactly 0.
    w1 = jnp.zeros((D, H2p), jnp.float32)
    w1 = w1.at[:, :H].set(w1m).at[:, H:H2].set(w1a).astype(jnp.bfloat16)
    b1 = jnp.zeros((1, H2p), jnp.float32)
    b1 = b1.at[:, :H].set(b1m).at[:, H:H2].set(b1a)
    w2 = jnp.zeros((H2p, C_pad), jnp.float32)
    w2 = w2.at[:H, :C].set(w2m).at[H:H2, C:2 * C].set(w2a).astype(jnp.bfloat16)
    b2 = jnp.zeros((1, C_pad), jnp.float32)
    b2 = b2.at[:, :C].set(b2m).at[:, C:2 * C].set(b2a)

    return dict(w1=w1, b1=b1, w2=w2, b2=b2, D=D, H=H, H2p=H2p, h_tile=h_tile,
                C=C, C_pad=C_pad, usable_vmem=usable, resident=(h_tile == H2p))


# ---------------------------------------------------------------------------
# Forward wrapper (mirrors TwoHeadFineTuner.forward, eval mode)
# ---------------------------------------------------------------------------
def two_head_finetuner_forward(embeds, packed, layer_idx=-1, b_tile=None):
    """embeds: (B, L, D) float32 — output of base_model.encode(sequences).
    Returns (main_logits, aux_logits), each (B, num_classes) float32."""
    # TODO(synk): base_model.encode(sequences) is an arbitrary external model;
    # the per-layer embeddings are taken as the kernel input here.
    B, L, D = embeds.shape
    C, C_pad = packed["C"], packed["C_pad"]
    H2p, h_tile = packed["H2p"], packed["h_tile"]
    resident = packed["resident"]
    usable = packed["usable_vmem"]

    # Layer selection stays a cheap f32 strided slice; the bf16 cast happens
    # in-kernel and ragged trailing batch blocks replace jnp.pad, so the
    # activation slab is not rewritten to HBM in a different dtype/padding.
    x = embeds[:, layer_idx, :]                                   # (B, D) f32

    # --- per-grid-step VMEM footprint --------------------------------------
    if resident:   # single-buffered, constant-index weights
        weight_bytes = D * H2p * 2 + H2p * 4 + H2p * C_pad * 2 + C_pad * 4
    else:          # streamed hidden chunks, double-buffered (b2 stays resident)
        weight_bytes = 2 * (D * h_tile * 2 + h_tile * 4 + h_tile * C_pad * 2) + C_pad * 4

    def step_bytes(bt):
        acts = 2 * bt * D * 4            # x tile, double-buffered f32
        outs = 2 * bt * C_pad * 4        # out tile, double-buffered f32
        acc = bt * C_pad * 4             # accumulator scratch
        hidden = bt * h_tile * (4 + 2)   # f32 hidden + its bf16 copy (live values)
        xcast = bt * D * 2               # bf16 cast of x
        return weight_bytes + acts + outs + acc + hidden + xcast

    # --- batch tile: largest tile that fits, capped at 512 rows ------------
    align = 128 if B >= 256 else 8       # 128-aligned M for the MXU when B allows
    if b_tile is None:
        b_tile = 512
        while b_tile > align and step_bytes(b_tile) > usable:
            b_tile //= 2
    b_tile = max(align, (int(b_tile) // align) * align)
    b_tile = min(b_tile, _round_up(B, align))
    # v7x megacore: give the 'parallel' batch axis >= 2 steps when B allows it.
    if pl.cdiv(B, b_tile) < 2 and b_tile > align:
        b_tile = max(align, _round_up(pl.cdiv(B, 2), align))

    grid = (pl.cdiv(B, b_tile), H2p // h_tile)

    cost = pl.CostEstimate(
        flops=int(2 * B * D * H2p + 2 * B * H2p * C_pad),
        transcendentals=0,
        bytes_accessed=int(B * D * 4 + B * C_pad * 4
                           + D * H2p * 2 + H2p * 4 + H2p * C_pad * 2 + C_pad * 4),
    )

    out = pl.pallas_call(
        fused_two_head_kernel,
        out_shape=jax.ShapeDtypeStruct((B, C_pad), jnp.float32),
        grid=grid,
        in_specs=[
            pl.BlockSpec((b_tile, D), lambda i, k: (i, 0)),                 # x: streamed
            _maybe_single_buffered((D, h_tile), lambda i, k: (0, k), resident),   # w1
            _maybe_single_buffered((1, h_tile), lambda i, k: (0, k), resident),   # b1
            _maybe_single_buffered((h_tile, C_pad), lambda i, k: (k, 0), resident),  # w2
            _maybe_single_buffered((1, C_pad), lambda i, k: (0, 0), True),        # b2
        ],
        out_specs=pl.BlockSpec((b_tile, C_pad), lambda i, k: (i, 0)),
        scratch_shapes=[pltpu.VMEM((b_tile, C_pad), jnp.float32)],
        compiler_params=pltpu.CompilerParams(
            dimension_semantics=("parallel", "arbitrary"),
            vmem_limit_bytes=int(usable),
        ),
        cost_estimate=cost,
    )(x, packed["w1"], packed["b1"], packed["w2"], packed["b2"])

    main_logits = out[:, :C]
    aux_logits = out[:, C:2 * C]
    return main_logits, aux_logits


# ---------------------------------------------------------------------------
# Init / reference (matches nn.Linear semantics, f32 throughout)
# ---------------------------------------------------------------------------
def init_params(key, embed_dim, num_classes):
    hidden = embed_dim // 2
    ks = jax.random.split(key, 8)

    def lin(kw, kb, fan_in, fan_out):
        bound = 1.0 / np.sqrt(fan_in)
        w = jax.random.uniform(kw, (fan_in, fan_out), jnp.float32, -bound, bound)
        b = jax.random.uniform(kb, (1, fan_out), jnp.float32, -bound, bound)
        return w, b

    w1m, b1m = lin(ks[0], ks[1], embed_dim, hidden)
    w2m, b2m = lin(ks[2], ks[3], hidden, num_classes)
    w1a, b1a = lin(ks[4], ks[5], embed_dim, hidden)
    w2a, b2a = lin(ks[6], ks[7], hidden, num_classes)
    return dict(w1m=w1m, b1m=b1m, w2m=w2m, b2m=b2m,
                w1a=w1a, b1a=b1a, w2a=w2a, b2a=b2a)


def reference_forward(embeds, params, layer_idx=-1):
    x = embeds[:, layer_idx, :]
    hm = jnp.maximum(x @ params["w1m"] + params["b1m"], 0.0)
    main = hm @ params["w2m"] + params["b2m"]
    ha = jnp.maximum(x @ params["w1a"] + params["b1a"], 0.0)
    aux = ha @ params["w2a"] + params["b2a"]
    return main, aux


if __name__ == "__main__":
    key = jax.random.PRNGKey(0)

    # --- Test 1: resident-weight path (small model) ------------------------
    B, L, D, C = 2, 4, 32, 8          # batch, num_layers, embed_dim, num_classes
    k_emb, k_par, key = jax.random.split(key, 3)
    embeds = jax.random.normal(k_emb, (B, L, D), jnp.float32)   # stands in for base.encode
    params = init_params(k_par, D, C)
    packed = pack_params(params, C)

    main_logits, aux_logits = two_head_finetuner_forward(embeds, packed, layer_idx=-1)
    jax.block_until_ready((main_logits, aux_logits))
    ref_main, ref_aux = reference_forward(embeds, params, layer_idx=-1)
    assert main_logits.shape == (B, C) and aux_logits.shape == (B, C)
    # bf16 operands with f32 accumulation -> looser tolerance than pure f32.
    np.testing.assert_allclose(np.asarray(main_logits), np.asarray(ref_main),
                               rtol=2e-2, atol=2e-2)
    np.testing.assert_allclose(np.asarray(aux_logits), np.asarray(ref_aux),
                               rtol=2e-2, atol=2e-2)

    # --- Test 2: hidden-chunked (streamed-weight / large-D) path -----------
    B2, L2, D2, C2 = 4, 3, 256, 8
    k_emb2, k_par2, key = jax.random.split(key, 3)
    embeds2 = jax.random.normal(k_emb2, (B2, L2, D2), jnp.float32)
    params2 = init_params(k_par2, D2, C2)
    packed2 = pack_params(params2, C2, force_h_tile=128)        # 2 hidden chunks
    main2, aux2 = two_head_finetuner_forward(embeds2, packed2, layer_idx=0)
    jax.block_until_ready((main2, aux2))
    ref_main2, ref_aux2 = reference_forward(embeds2, params2, layer_idx=0)
    np.testing.assert_allclose(np.asarray(main2), np.asarray(ref_main2),
                               rtol=5e-2, atol=5e-2)
    np.testing.assert_allclose(np.asarray(aux2), np.asarray(ref_aux2),
                               rtol=5e-2, atol=5e-2)

    print("KERNEL_OK")
</pallas_src>

<mosaic_0001>
module attributes {stable_mosaic.version = 11 : i64} {
  func.func @fused_two_head_kernel(%arg0: i32, %arg1: i32, %arg2: memref<8x32xf32, #tpu.memory_space<vmem>>, %arg3: memref<32x32xbf16, #tpu.memory_space<vmem>>, %arg4: memref<1x32xf32, #tpu.memory_space<vmem>>, %arg5: memref<32x128xbf16, #tpu.memory_space<vmem>>, %arg6: memref<1x128xf32, #tpu.memory_space<vmem>>, %arg7: memref<8x128xf32, #tpu.memory_space<vmem>>, %arg8: memref<8x128xf32, #tpu.memory_space<vmem>>) attributes {dimension_semantics = [#tpu.dimension_semantics<parallel>, #tpu.dimension_semantics<arbitrary>], iteration_bounds = array<i64: 1, 1>, scalar_prefetch = 0 : i64, scratch_operands = 1 : i64, tpu.core_type = #tpu.core_type<tc>, window_params = [{transform_indices = @transform_0, window_bounds = array<i64: 8, 32>}, {pipeline_mode = #tpu.pipeline_mode<synchronous>, transform_indices = @transform_1, window_bounds = array<i64: 32, 32>}, {pipeline_mode = #tpu.pipeline_mode<synchronous>, transform_indices = @transform_2, window_bounds = array<i64: 1, 32>}, {pipeline_mode = #tpu.pipeline_mode<synchronous>, transform_indices = @transform_3, window_bounds = array<i64: 32, 128>}, {pipeline_mode = #tpu.pipeline_mode<synchronous>, transform_indices = @transform_4, window_bounds = array<i64: 1, 128>}, {transform_indices = @transform_5, window_bounds = array<i64: 8, 128>}]} {
    %c0_i32 = arith.constant 0 : i32
    %0 = arith.cmpi eq, %arg1, %c0_i32 : i32
    %1 = arith.extui %0 : i1 to i32
    %c0_i32_0 = arith.constant 0 : i32
    %2 = arith.cmpi ne, %1, %c0_i32_0 : i32
    scf.if %2 {
      %cst_16 = arith.constant 0.000000e+00 : f32
      %21 = vector.broadcast %cst_16 : f32 to vector<8x128xf32>
      %c0_17 = arith.constant 0 : index
      %c0_18 = arith.constant 0 : index
      %22 = vector.load %arg8[%c0_17, %c0_18] : memref<8x128xf32, #tpu.memory_space<vmem>>, vector<8x128xf32>
      tpu.vector_store %arg8[%c0_17, %c0_18], %21 {strides = array<i32>} : memref<8x128xf32, #tpu.memory_space<vmem>>, vector<8x128xf32>,
    } else {
    }
    %c0 = arith.constant 0 : index
    %c0_1 = arith.constant 0 : index
    %3 = vector.load %arg2[%c0, %c0_1] : memref<8x32xf32, #tpu.memory_space<vmem>>, vector<8x32xf32>
    %4 = arith.truncf %3 : vector<8x32xf32> to vector<8x32xbf16>
    %c0_2 = arith.constant 0 : index
    %c0_3 = arith.constant 0 : index
    %5 = vector.load %arg3[%c0_2, %c0_3] : memref<32x32xbf16, #tpu.memory_space<vmem>>, vector<32x32xbf16>
    %cst = arith.constant dense<0.000000e+00> : vector<8x32xf32>
    %6 = tpu.matmul %4, %5, %cst {dimension_numbers = #tpu.dot_dimension_numbers<[1], [0], [0], [1], [0, 0, 1, 1], [], []>} : vector<8x32xbf16>, vector<32x32xbf16>, vector<8x32xf32> -> vector<8x32xf32>
    %c0_4 = arith.constant 0 : index
    %c0_5 = arith.constant 0 : index
    %7 = vector.load %arg4[%c0_4, %c0_5] : memref<1x32xf32, #tpu.memory_space<vmem>>, vector<1x32xf32>
    %8 = vector.broadcast %7 : vector<1x32xf32> to vector<8x32xf32>
    %9 = arith.addf %6, %8 : vector<8x32xf32>
    %cst_6 = arith.constant 0.000000e+00 : f32
    %10 = vector.broadcast %cst_6 : f32 to vector<8x32xf32>
    %11 = arith.maximumf %9, %10 : vector<8x32xf32>
    %c0_7 = arith.constant 0 : index
    %c0_8 = arith.constant 0 : index
    %12 = vector.load %arg8[%c0_7, %c0_8] : memref<8x128xf32, #tpu.memory_space<vmem>>, vector<8x128xf32>
    %13 = arith.truncf %11 : vector<8x32xf32> to vector<8x32xbf16>
    %c0_9 = arith.constant 0 : index
    %c0_10 = arith.constant 0 : index
    %14 = vector.load %arg5[%c0_9, %c0_10] : memref<32x128xbf16, #tpu.memory_space<vmem>>, vector<32x128xbf16>
    %cst_11 = arith.constant dense<0.000000e+00> : vector<8x128xf32>
    %15 = tpu.matmul %13, %14, %cst_11 {dimension_numbers = #tpu.dot_dimension_numbers<[1], [0], [0], [1], [0, 0, 1, 1], [], []>} : vector<8x32xbf16>, vector<32x128xbf16>, vector<8x128xf32> -> vector<8x128xf32>
    %16 = arith.addf %12, %15 : vector<8x128xf32>
    %c0_12 = arith.constant 0 : index
    %c0_13 = arith.constant 0 : index
    %17 = vector.load %arg8[%c0_12, %c0_13] : memref<8x128xf32, #tpu.memory_space<vmem>>, vector<8x128xf32>
    tpu.vector_store %arg8[%c0_12, %c0_13], %16 {strides = array<i32>} : memref<8x128xf32, #tpu.memory_space<vmem>>, vector<8x128xf32>,
    %c0_i32_14 = arith.constant 0 : i32
    %18 = arith.cmpi eq, %arg1, %c0_i32_14 : i32
    %19 = arith.extui %18 : i1 to i32
    %c0_i32_15 = arith.constant 0 : i32
    %20 = arith.cmpi ne, %19, %c0_i32_15 : i32
    scf.if %20 {
      %c0_16 = arith.constant 0 : index
      %c0_17 = arith.constant 0 : index
      %21 = vector.load %arg8[%c0_16, %c0_17] : memref<8x128xf32, #tpu.memory_space<vmem>>, vector<8x128xf32>
      %c0_18 = arith.constant 0 : index
      %c0_19 = arith.constant 0 : index
      %22 = vector.load %arg6[%c0_18, %c0_19] : memref<1x128xf32, #tpu.memory_space<vmem>>, vector<1x128xf32>
      %23 = vector.broadcast %22 : vector<1x128xf32> to vector<8x128xf32>
      %24 = arith.addf %21, %23 : vector<8x128xf32>
      %c0_20 = arith.constant 0 : index
      %c0_21 = arith.constant 0 : index
      %25 = vector.load %arg7[%c0_20, %c0_21] : memref<8x128xf32, #tpu.memory_space<vmem>>, vector<8x128xf32>
      tpu.vector_store %arg7[%c0_20, %c0_21], %24 {strides = array<i32>} : memref<8x128xf32, #tpu.memory_space<vmem>>, vector<8x128xf32>,
    } else {
    }
    return
  }
  func.func @transform_0(%arg0: i32, %arg1: i32) -> (i32, i32) {
    %c0_i32 = arith.constant 0 : i32
    %c0_i32_0 = arith.constant 0 : i32
    return %arg0, %c0_i32 : i32, i32
  }
  func.func @transform_1(%arg0: i32, %arg1: i32) -> (i32, i32) {
    %c0_i32 = arith.constant 0 : i32
    %c0_i32_0 = arith.constant 0 : i32
    return %c0_i32, %arg1 : i32, i32
  }
  func.func @transform_2(%arg0: i32, %arg1: i32) -> (i32, i32) {
    %c0_i32 = arith.constant 0 : i32
    %c0_i32_0 = arith.constant 0 : i32
    return %c0_i32, %arg1 : i32, i32
  }
  func.func @transform_3(%arg0: i32, %arg1: i32) -> (i32, i32) {
    %c0_i32 = arith.constant 0 : i32
    %c0_i32_0 = arith.constant 0 : i32
    return %arg1, %c0_i32 : i32, i32
  }
  func.func @transform_4(%arg0: i32, %arg1: i32) -> (i32, i32) {
    %c0_i32 = arith.constant 0 : i32
    %c0_i32_0 = arith.constant 0 : i32
    %c0_i32_1 = arith.constant 0 : i32
    return %c0_i32, %c0_i32_0 : i32, i32
  }
  func.func @transform_5(%arg0: i32, %arg1: i32) -> (i32, i32) {
    %c0_i32 = arith.constant 0 : i32
    %c0_i32_0 = arith.constant 0 : i32
    return %arg0, %c0_i32 : i32, i32
  }
}

</mosaic_0001>

<bundles_post_ra>
// kernel: tpu_custom_call.1
= control target key start
LH: loop header
LB: loop body
LE: loop exit
PB: predicated region body
PF: predicated region fallthrough
CT: control target
= control target key end

     0   :  { %10 = vsyncpa [#allocation4], 0  ;;  %s476_s0 = inlined_call_operand.hbm [shape: f32[2,32], index: 0, kind: input, shape index: {}]   ;;  %s477_s1 = inlined_call_operand.hbm [shape: bf16[32,32], index: 1, kind: input, shape index: {}]   ;;  %s478_s2 = inlined_call_operand.vmem [shape: f32[1,32], index: 2, kind: input, shape index: {}]   ;;  %s479_s3 = inlined_call_operand.hbm [shape: bf16[32,128], index: 3, kind: input, shape index: {}]   ;;  %s480_s4 = inlined_call_operand.vmem [shape: f32[1,128], index: 4, kind: input, shape index: {}]   ;;  %s481_s5 = inlined_call_operand.hbm [shape: f32[2,128], index: 5, kind: output, shape index: {}]  }
   0x1   :  { %11 = vsyncpa [#allocation7], 0 }
   0x2   :  { %12 = vsyncpa [#allocation5], 0 }
   0x3   :  { %17 = vsyncadd [#allocation4], 96  ;;  %s370_s18 = smov [#allocation6]   ;;  %s276_s22 = scalar_lea.hbm %s477_s1, 256 }
   0x4   :  { %s30_s19 = sshll.u32 %s370_s18, 4  ;;  %p277_p0 = scmp.ne.s32.totalorder %s477_s1, %s276_s22  ;;  %s31_s19 = int_to_ptr.vmem [resolvable:$true] %s30_s19 }
   0x5   :  { %p280_p1 = scmp.lt.u32.totalorder %s276_s22, %s477_s1 }
   0x7   :  { %p282_p2 = pnand %p280_p1, %p277_p0 }
   0x9   :  { %285 = shalt.err (!%p282_p2)
}
   0xa   :  { %s286_s27 = scalar_lea.vmem %s31_s19, 256  ;;  %p291_p4 = scmp.lt.s32.totalorder %s31_s19, %s31_s19 }
   0xb   :  { %p287_p3 = scmp.ne.s32.totalorder %s31_s19, %s286_s27  ;;  %p292_p5 = scmp.lt.s32.totalorder %s286_s27, %s286_s27 }
   0xd   :  { %p293_p6 = por %p292_p5, %p291_p4 }
   0xf   :  { %p294_p7 = pnand %p293_p6, %p287_p3 }
  0x11   :  { %297 = shalt.err (!%p294_p7)
}
  0x12   :  { %s371_s28 = smov 64   ;;  %s372_s29 = smov 4  }
  0x13   :  { %36 = dma.hbm_to_vmem [thread:$0]  %s477_s1, 256, %s31_s19, [#allocation7], %s371_s28, %s371_s28, %s372_s29  }
  0x14   :  { %s373_s7 = smov [#allocation3]   ;;  %s298_s11 = scalar_lea.hbm %s476_s0, 32 }
  0x15   :  { %s18_s8 = sshll.u32 %s373_s7, 4  ;;  %p299_p8 = scmp.ne.s32.totalorder %s476_s0, %s298_s11  ;;  %s19_s8 = int_to_ptr.vmem [resolvable:$true] %s18_s8 }
  0x16   :  { %p302_p9 = scmp.lt.u32.totalorder %s298_s11, %s476_s0 }
  0x18   :  { %p304_p10 = pnand %p302_p9, %p299_p8 }
  0x1a   :  { %307 = shalt.err (!%p304_p10)
}
  0x1b   :  { %s308_s16 = scalar_lea.vmem %s19_s8, 32  ;;  %s312_s1 = scalar_lea.vmem %s19_s8, 128 }
  0x1c   :  { %p309_p11 = scmp.ne.s32.totalorder %s19_s8, %s308_s16  ;;  %p313_p12 = scmp.lt.s32.totalorder %s19_s8, %s19_s8 }
  0x1d   :  { %p314_p13 = scmp.lt.s32.totalorder %s312_s1, %s308_s16 }
  0x1f   :  { %p315_p0 = por %p314_p13, %p313_p12 }
  0x21   :  { %p316_p1 = pnand %p315_p0, %p309_p11 }
  0x23   :  { %319 = shalt.err (!%p316_p1)
}
  0x24   :  { %s374_s17 = smov 32   ;;  %s375_s18 = smov 2  }
  0x25   :  { %24 = dma.hbm_to_vmem [thread:$0]  %s476_s0, 32, %s19_s8, [#allocation4], %s374_s17, %s374_s17, %s375_s18  }
  0x26   :  { %s376_s21 = smov [#allocation8]   ;;  %s320_s25 = scalar_lea.hbm %s479_s3, 256 }
  0x27   :  { %s44_s22 = sshll.u32 %s376_s21, 4  ;;  %p321_p2 = scmp.ne.s32.totalorder %s479_s3, %s320_s25  ;;  %s45_s22 = int_to_ptr.vmem [resolvable:$true] %s44_s22 }
  0x28   :  { %p324_p3 = scmp.lt.u32.totalorder %s320_s25, %s479_s3 }
  0x2a   :  { %p326_p4 = pnand %p324_p3, %p321_p2 }
  0x2c   :  { %329 = shalt.err (!%p326_p4)
}
  0x2d   :  { %s330_s7 = scalar_lea.vmem %s45_s22, 256  ;;  %p335_p6 = scmp.lt.s32.totalorder %s45_s22, %s45_s22 }
  0x2e   :  { %p331_p5 = scmp.ne.s32.totalorder %s45_s22, %s330_s7  ;;  %p336_p7 = scmp.lt.s32.totalorder %s330_s7, %s330_s7 }
  0x30   :  { %p337_p8 = por %p336_p7, %p335_p6 }
  0x32   :  { %p338_p9 = pnand %p337_p8, %p331_p5 }
  0x34   :  { %341 = shalt.err (!%p338_p9)
}
  0x35   :  { %50 = dma.hbm_to_vmem [thread:$0]  %s479_s3, 256, %s45_s22, [#allocation7], %s371_s28, %s371_s28, %s372_s29  }
  0x36   :  { %364 = dma.done.wait [#allocation4], 128  }
  0x37   :  { %365 = vsyncadd [#allocation4], 4294967168 }
  0x38   :  { %366 = dma.done.wait [#allocation7], 512  }
  0x39   :  { %367 = vsyncadd [#allocation7], 4294966784  ;;  %v377_v0 = vmov 0.0   ;;  %vm378_vm0 = vmmov 0   ;;  %v272_v1 = vld [vmem:[#allocation6] sm:$0xff]   ;;  %v273_v2 = vld [vmem:[#allocation6 + $0x8] sm:$0xff]  }
  0x3a   :  { %246 = vmatprep.subr.bf16.mxu0 %v377_v0  ;;  %250 = vmatprep.mubr.msk.bf16.mxu0 %vm378_vm0, %v377_v0  ;;  %v68_v3 = vld [vmem:[#allocation3] sm:$0xff]  ;;  %vm93_vm1 = vcmask 261120   ;;  %v274_v5 = vld [vmem:[#allocation8] sm:$0xff]  }
  0x3b   :  { %254 = vmatprep.subr.bf16.mxu1 %v377_v0  ;;  %258 = vmatprep.mubr.msk.bf16.mxu1 %vm378_vm0, %v377_v0  ;;  %v69_v4 = vpack.c.bf16 %v68_v3, %v68_v3  ;;  %v275_v6 = vld [vmem:[#allocation8 + $0x8] sm:$0xff]  }
  0x3c   :  { %247 = vmatpush3.bf16.msra.mxu0 %v272_v1  ;;  %255 = vmatpush3.bf16.msra.mxu1 %v274_v5  ;;  %v232_v7 = vld [vmem:[%s478_s2] ss:$0 sm:$0xff] }
  0x3d   :  { %248 = vmatprep.subr.bf16.mxu0 %v377_v0  ;;  %256 = vmatprep.subr.bf16.mxu1 %v377_v0  ;;  %v239_v15 = vld [vmem:[%s480_s4] ss:$0 sm:$0xff] }
  0x40   :  { %249 = vmatpush3.bf16.msra.mxu0 %v273_v2  ;;  %257 = vmatpush3.bf16.msra.mxu1 %v275_v6 }
  0x43   :  { %251 = vmatmul.mubr.msk.bf16.vlgmr.msra.gmra.mrb[0].mxu0 %vm93_vm1, %v69_v4 }
 0x116   :  { %v131_v8 = vpop.f32.mrb[0].mxu0 }
 0x117   :  { %v132_v9 = vadd.f32 %v232_v7, %v131_v8  ;;  %v252_v10 = vpop.f32.mrb[1].mxu0 }
 0x118   :  { %v134_v11 = vpop.f32.mrb[2].mxu0 }
 0x119   :  { %v137_v12 = vmax.f32 %v132_v9, 0.0  ;;  %v253_v13 = vpop.f32.mrb[3].mxu0 }
 0x11b   :  { %v139_v14 = vpack.c.bf16 %v137_v12, %v137_v12 }
 0x11d   :  { %259 = vmatmul.mubr.msk.bf16.vlgmr.msra.gmra.mrb[0].mxu1 %vm93_vm1, %v139_v14 }
 0x1f0   :  { %v193_v16 = vpop.f32.mrb[0].mxu1 }
 0x1f1   :  { %v212_v17 = vadd.f32 %v239_v15, %v193_v16  ;;  %v260_v18 = vpop.f32.mrb[1].mxu1 }
 0x1f2   :  { %v196_v19 = vpop.f32.mrb[2].mxu1 }
 0x1f3   :  { %213 = vst [vmem:[#allocation9] sm:$0xff] %v212_v17  ;;  %v261_v20 = vpop.f32.mrb[3].mxu1 }
 0x1f4   :  { %218 = vsyncadd [#allocation5], 96  ;;  %s379_s2 = smov [#allocation9]  }
 0x1f5   :  { %s219_s10 = sshll.u32 %s379_s2, 4  ;;  %s220_s10 = int_to_ptr.vmem [resolvable:$true] %s219_s10 }
 0x1f6   :  { %s342_s11 = scalar_lea.vmem %s220_s10, 32  ;;  %s346_s12 = scalar_lea.vmem %s220_s10, 128 }
 0x1f7   :  { %p343_p10 = scmp.ne.s32.totalorder %s220_s10, %s342_s11  ;;  %p347_p11 = scmp.lt.s32.totalorder %s220_s10, %s220_s10 }
 0x1f8   :  { %p348_p12 = scmp.lt.s32.totalorder %s346_s12, %s342_s11 }
 0x1fa   :  { %p349_p13 = por %p348_p12, %p347_p11 }
 0x1fc   :  { %p350_p0 = pnand %p349_p13, %p343_p10 }
 0x1fe   :  { %353 = shalt.err (!%p350_p0)
}
 0x1ff   :  { %s354_s14 = scalar_lea.hbm %s481_s5, 32 }
 0x200   :  { %p355_p1 = scmp.ne.s32.totalorder %s481_s5, %s354_s14  ;;  %p358_p2 = scmp.lt.u32.totalorder %s354_s14, %s481_s5 }
 0x202   :  { %p360_p3 = pnand %p358_p2, %p355_p1 }
 0x204   :  { %363 = shalt.err (!%p360_p3)
}
 0x205   :  { %225 = dma.vmem_to_hbm [thread:$0]  %s220_s10, 32, %s481_s5, [#allocation5], %s374_s17, %s374_s17, %s375_s18  }
 0x206   :  { %368 = dma.done.wait [#allocation5], 128  }
 0x207   :  { %369 = vsyncadd [#allocation5], 4294967168 }
 0x208   :  { %229 = vsyncpa [#allocation4], 1 }
 0x209   :  { %230 = vsyncpa [#allocation7], 1 }
 0x20a   :  { %231 = vsyncpa [#allocation5], 1 }

</bundles_post_ra>
